<compile_context>
chip_gen: v7x
topology: tpu7x:2x2x1
jax: 0.10.0
libtpu: 0.0.40
codegen_flags: <defaults>
</compile_context>

<pallas_src>
import functools

import jax
import jax.numpy as jnp
from jax import lax
from jax.experimental import pallas as pl
from jax.experimental.pallas import tpu as pltpu


def _round_up(x, m):
    return (x + m - 1) // m * m


def _vmem_limit_bytes():
    # ~75% of physical VMEM: ~48 MiB on v7x (64 MiB phys), ~96 MiB on v5e/v6e (128 MiB).
    try:
        cap = int(pltpu.get_tpu_info().vmem_capacity_bytes)
    except Exception:
        cap = 64 * 1024 * 1024
    return max(32 * 1024 * 1024, min(cap * 3 // 4, 100 * 1024 * 1024))


# ---------- Kernel 1: fused im2col conv (MXU) + per-image mean-centered BN stats ----------
def _conv_stats_kernel(w_ref, x_ref, mask_ref, conv_ref, sum_ref, m2_ref, *,
                       kh, kw, dil, stride, wp, hout, wout, mp, inv_cnt):
    # w_ref:    (Kh*Kw, Cout, Cin)  bf16  one (Cout, Cin) matmul LHS per conv tap
    # x_ref:    (1, Cin, L_pad)     bf16  flattened zero-padded image (lane axis = Hp*Wp)
    # mask_ref: (1, Mp)             f32   1.0 at valid positions of the Wp-lattice
    # conv_ref: (1, Cout, HWd)      bf16  dense (Hout*Wout) conv output for this image
    # sum_ref:  (1, Cout, 1)        f32   per-image sum over valid positions
    # m2_ref:   (1, Cout, 1)        f32   per-image mean-centered sum of squares
    cout = conv_ref.shape[1]
    hwd = conv_ref.shape[2]

    # Conv on the padded-width lattice: out[:, p] uses input q = stride*p + i*dil*Wp + j*dil.
    acc = jnp.zeros((cout, mp), jnp.float32)
    for i in range(kh):
        for j in range(kw):
            off = i * dil * wp + j * dil
            if stride == 1:
                xs = x_ref[0, :, off:off + mp]                        # (Cin, Mp)
            else:
                xs = x_ref[0, :, pl.ds(off, mp, stride=stride)]       # strided lane gather
            acc = acc + jnp.dot(w_ref[i * kw + j], xs,
                                preferred_element_type=jnp.float32)

    # BN partial statistics in f32 (before the bf16 cast); garbage lattice columns masked.
    validf = mask_ref[...]                                            # (1, Mp)
    s = jnp.sum(acc * validf, axis=1, keepdims=True)                  # (Cout, 1)
    mean = s * inv_cnt
    d = (acc - mean) * validf
    sum_ref[0, :, :] = s
    m2_ref[0, :, :] = jnp.sum(d * d, axis=1, keepdims=True)

    # Compact the Wp-lattice into a dense, lane-dense (Cout, Hout*Wout) bf16 intermediate.
    if wp == wout:                      # 1x1 conv / no width padding: lattices coincide
        conv_ref[0, :, :hout * wout] = acc[:, :hout * wout].astype(conv_ref.dtype)
    else:
        for h in range(hout):
            conv_ref[0, :, h * wout:(h + 1) * wout] = (
                acc[:, h * wp:h * wp + wout].astype(conv_ref.dtype))
    if hwd > hout * wout:               # zero the lane padding so kernel 2 reads no junk
        conv_ref[0, :, hout * wout:] = jnp.zeros((cout, hwd - hout * wout), conv_ref.dtype)


# ---------------- Kernel 2: y = relu(conv * scale + shift) (pure FMA + ReLU) ----------------
def _bn_relu_kernel(conv_ref, scale_ref, shift_ref, o_ref):
    x = conv_ref[0].astype(jnp.float32)                 # (Cout, tile) bf16 -> f32
    y = x * scale_ref[...] + shift_ref[...]             # (Cout, 1) broadcast over lanes
    o_ref[0, :, :] = jnp.maximum(y, 0.0).astype(o_ref.dtype)


def conv_bn_relu(x, conv_w, conv_b, bn_gamma, bn_beta, *,
                 stride=1, padding=0, dilation=1, eps=1e-5,
                 tile_hw=2048, return_batch_stats=False):
    """x: (N, Cin, H, W) f32; conv_w: (Cout, Cin, Kh, Kw); returns (N, Cout, Hout, Wout).

    Training-mode BatchNorm (batch statistics).  If return_batch_stats=True, also returns
    (batch_mean, batch_var_unbiased) so a caller can update nn.BatchNorm2d running stats.
    """
    n, cin, h, w = x.shape
    cout, cin_w, kh, kw = conv_w.shape
    assert cin == cin_w, "TODO(synk): groups != 1 not implemented (module default only)."
    # TODO(synk): padding_mode != 'zeros' not implemented (module default only).

    eff_kh = dilation * (kh - 1) + 1
    eff_kw = dilation * (kw - 1) + 1
    hout = (h + 2 * padding - eff_kh) // stride + 1
    wout = (w + 2 * padding - eff_kw) // stride + 1
    hp, wp = h + 2 * padding, w + 2 * padding
    hw_raw = hout * wout

    # Wp-lattice extent (p = h*Wp + w) and padded flattened-input length (+ shift slack).
    mp = _round_up(hout * wp, 128)
    o_max = (kh - 1) * dilation * wp + (kw - 1) * dilation
    l_pad = _round_up(max(stride * (mp - 1) + o_max + 1, hp * wp), 128)

    # Dense-output tiling: tile is a multiple of 128 and divides hwd exactly.
    tile_hw = max(128, (int(tile_hw) // 128) * 128)
    tile = min(_round_up(hw_raw, 128), tile_hw)
    hwd = _round_up(hw_raw, tile)

    # Host-side prep (cheap): zero-pad, flatten, bf16 (MXU-native, halves input DMA bytes).
    xp = jnp.pad(x.astype(jnp.bfloat16),
                 ((0, 0), (0, 0), (padding, padding), (padding, padding)))
    xflat = jnp.pad(xp.reshape(n, cin, hp * wp), ((0, 0), (0, 0), (0, l_pad - hp * wp)))
    w_taps = jnp.transpose(conv_w, (2, 3, 0, 1)).reshape(kh * kw, cout, cin)
    w_taps = w_taps.astype(jnp.bfloat16)
    pidx = jnp.arange(mp, dtype=jnp.int32)
    valid = ((pidx < hout * wp) & (pidx % wp < wout)).astype(jnp.float32).reshape(1, mp)

    # Conv bias is cancelled exactly by the batch-mean subtraction -> dropped in-kernel;
    # it is added back to the returned batch_mean so running-stat updates stay correct.

    vmem_limit = _vmem_limit_bytes()
    k1 = functools.partial(_conv_stats_kernel, kh=kh, kw=kw, dil=dilation, stride=stride,
                           wp=wp, hout=hout, wout=wout, mp=mp,
                           inv_cnt=1.0 / float(hw_raw))
    conv_c, psum, pm2 = pl.pallas_call(
        k1,
        out_shape=(jax.ShapeDtypeStruct((n, cout, hwd), jnp.bfloat16),
                   jax.ShapeDtypeStruct((n, cout, 1), jnp.float32),
                   jax.ShapeDtypeStruct((n, cout, 1), jnp.float32)),
        grid=(n,),
        in_specs=[
            pl.BlockSpec((kh * kw, cout, cin), lambda b: (0, 0, 0)),
            pl.BlockSpec((1, cin, l_pad), lambda b: (b, 0, 0)),
            pl.BlockSpec((1, mp), lambda b: (0, 0)),
        ],
        out_specs=(
            pl.BlockSpec((1, cout, hwd), lambda b: (b, 0, 0)),
            pl.BlockSpec((1, cout, 1), lambda b: (b, 0, 0)),
            pl.BlockSpec((1, cout, 1), lambda b: (b, 0, 0)),
        ),
        compiler_params=pltpu.CompilerParams(
            dimension_semantics=("parallel",), vmem_limit_bytes=vmem_limit),
    )(w_taps, xflat, valid)

    # Tiny cross-image reduction: Chan's parallel-variance combine in f32.
    cnt_i = float(hw_raw)
    total = float(n * hw_raw)
    s_i = psum[:, :, 0]                                    # (N, Cout)
    m2_i = pm2[:, :, 0]
    mean_i = s_i / cnt_i
    mean = jnp.sum(s_i, axis=0) / total                    # (Cout,)
    m2 = jnp.sum(m2_i, axis=0) + cnt_i * jnp.sum((mean_i - mean[None, :]) ** 2, axis=0)
    var = m2 / total                                       # biased (PyTorch BN normalize)
    inv_std = lax.rsqrt(var + eps)
    gamma = bn_gamma.astype(jnp.float32)
    beta = bn_beta.astype(jnp.float32)
    scale = (gamma * inv_std).reshape(cout, 1)
    shift = (beta - mean * gamma * inv_std).reshape(cout, 1)

    out_flat = pl.pallas_call(
        _bn_relu_kernel,
        out_shape=jax.ShapeDtypeStruct((n, cout, hwd), jnp.float32),
        grid=(n, hwd // tile),
        in_specs=[
            pl.BlockSpec((1, cout, tile), lambda b, t: (b, 0, t)),
            pl.BlockSpec((cout, 1), lambda b, t: (0, 0)),
            pl.BlockSpec((cout, 1), lambda b, t: (0, 0)),
        ],
        out_specs=pl.BlockSpec((1, cout, tile), lambda b, t: (b, 0, t)),
        compiler_params=pltpu.CompilerParams(
            dimension_semantics=("parallel", "parallel"), vmem_limit_bytes=vmem_limit),
    )(conv_c, scale, shift)

    # Free when hw_raw is already a multiple of 128 (slice elided, reshape is a bitcast).
    out = out_flat[:, :, :hw_raw].reshape(n, cout, hout, wout)

    if not return_batch_stats:
        return out
    batch_mean = mean + (conv_b.astype(jnp.float32) if conv_b is not None else 0.0)
    batch_var_unbiased = m2 / max(total - 1.0, 1.0)
    return out, batch_mean, batch_var_unbiased


if __name__ == "__main__":
    # Module config: ConvBnRelu(in_channels=4, out_channels=8, kernel_size=3,
    #                           stride=1, padding=1, bias=True)
    N, CIN, H, W = 2, 4, 16, 16
    COUT, KSIZE, STRIDE, PAD = 8, 3, 1, 1
    EPS = 1e-5

    key = jax.random.PRNGKey(0)
    kx, kw_, kb = jax.random.split(key, 3)

    x = jax.random.normal(kx, (N, CIN, H, W), dtype=jnp.float32)
    conv_w = jax.random.normal(kw_, (COUT, CIN, KSIZE, KSIZE), dtype=jnp.float32) * 0.1
    conv_b = jax.random.normal(kb, (COUT,), dtype=jnp.float32) * 0.1
    # BatchNorm2d default init: weight=1, bias=0
    bn_gamma = jnp.ones((COUT,), dtype=jnp.float32)
    bn_beta = jnp.zeros((COUT,), dtype=jnp.float32)

    out, b_mean, b_var = conv_bn_relu(x, conv_w, conv_b, bn_gamma, bn_beta,
                                      stride=STRIDE, padding=PAD, dilation=1, eps=EPS,
                                      return_batch_stats=True)
    jax.block_until_ready(out)

    # Pure-JAX reference (includes the conv bias -> verifies the bias-cancellation claim).
    ref_conv = lax.conv_general_dilated(
        x, conv_w, window_strides=(STRIDE, STRIDE),
        padding=[(PAD, PAD), (PAD, PAD)],
        dimension_numbers=("NCHW", "OIHW", "NCHW")) + conv_b.reshape(1, COUT, 1, 1)
    r_mean = ref_conv.mean(axis=(0, 2, 3))
    r_var = ref_conv.var(axis=(0, 2, 3))     # biased, as used for normalization
    ref = jnp.maximum(
        (ref_conv - r_mean.reshape(1, COUT, 1, 1)) * lax.rsqrt(r_var.reshape(1, COUT, 1, 1) + EPS)
        * bn_gamma.reshape(1, COUT, 1, 1) + bn_beta.reshape(1, COUT, 1, 1), 0.0)

    assert out.shape == (N, COUT, H, W), out.shape
    assert bool(jnp.isfinite(out).all()) and bool(jnp.all(out >= 0.0))
    # bf16 matmul inputs + bf16 conv intermediate -> loose tolerance on O(1) output.
    err = float(jnp.max(jnp.abs(out - ref)))
    assert err < 0.1, err
    # Batch stats returned for running-stat updates: mean includes conv bias, var unbiased.
    cnt = N * H * W
    r_var_unb = r_var * (cnt / (cnt - 1))
    assert float(jnp.max(jnp.abs(b_mean - r_mean))) < 0.05
    assert float(jnp.max(jnp.abs(b_var - r_var_unb))) < 0.05
    print("KERNEL_OK")
</pallas_src>

<mosaic_0001>
module attributes {stable_mosaic.version = 11 : i64} {
  func.func @_conv_stats_kernel(%arg0: i32, %arg1: memref<9x8x4xbf16, #tpu.memory_space<vmem>>, %arg2: memref<1x4x512xbf16, #tpu.memory_space<vmem>>, %arg3: memref<1x384xf32, #tpu.memory_space<vmem>>, %arg4: memref<1x8x256xbf16, #tpu.memory_space<vmem>>, %arg5: memref<1x8x1xf32, #tpu.memory_space<vmem>>, %arg6: memref<1x8x1xf32, #tpu.memory_space<vmem>>) attributes {dimension_semantics = [#tpu.dimension_semantics<parallel>], iteration_bounds = array<i64: 2>, scalar_prefetch = 0 : i64, scratch_operands = 0 : i64, tpu.core_type = #tpu.core_type<tc>, window_params = [{pipeline_mode = #tpu.pipeline_mode<synchronous>, transform_indices = @transform_0, window_bounds = array<i64: 9, 8, 4>}, {transform_indices = @transform_1, window_bounds = array<i64: 1, 4, 512>}, {pipeline_mode = #tpu.pipeline_mode<synchronous>, transform_indices = @transform_2, window_bounds = array<i64: 1, 384>}, {transform_indices = @transform_3, window_bounds = array<i64: 1, 8, 256>}, {transform_indices = @transform_4, window_bounds = array<i64: 1, 8, 1>}, {transform_indices = @transform_5, window_bounds = array<i64: 1, 8, 1>}]} {
    %cst = arith.constant 0.000000e+00 : f32
    %0 = vector.broadcast %cst : f32 to vector<8x384xf32>
    %c0 = arith.constant 0 : index
    %c0_0 = arith.constant 0 : index
    %c0_1 = arith.constant 0 : index
    %1 = vector.load %arg2[%c0, %c0_0, %c0_1] : memref<1x4x512xbf16, #tpu.memory_space<vmem>>, vector<1x4x384xbf16>
    %2 = vector.shape_cast %1 : vector<1x4x384xbf16> to vector<4x384xbf16>
    %c0_2 = arith.constant 0 : index
    %c0_3 = arith.constant 0 : index
    %c0_4 = arith.constant 0 : index
    %3 = vector.load %arg1[%c0_2, %c0_3, %c0_4] : memref<9x8x4xbf16, #tpu.memory_space<vmem>>, vector<1x8x4xbf16>
    %4 = vector.shape_cast %3 : vector<1x8x4xbf16> to vector<8x4xbf16>
    %cst_5 = arith.constant dense<0.000000e+00> : vector<8x384xf32>
    %5 = tpu.matmul %4, %2, %cst_5 {dimension_numbers = #tpu.dot_dimension_numbers<[1], [0], [0], [1], [0, 0, 1, 1], [], []>} : vector<8x4xbf16>, vector<4x384xbf16>, vector<8x384xf32> -> vector<8x384xf32>
    %6 = arith.addf %0, %5 : vector<8x384xf32>
    %c0_6 = arith.constant 0 : index
    %c0_7 = arith.constant 0 : index
    %c1 = arith.constant 1 : index
    %7 = vector.load %arg2[%c0_6, %c0_7, %c1] : memref<1x4x512xbf16, #tpu.memory_space<vmem>>, vector<1x4x384xbf16>
    %8 = vector.shape_cast %7 : vector<1x4x384xbf16> to vector<4x384xbf16>
    %c1_8 = arith.constant 1 : index
    %c0_9 = arith.constant 0 : index
    %c0_10 = arith.constant 0 : index
    %9 = vector.load %arg1[%c1_8, %c0_9, %c0_10] : memref<9x8x4xbf16, #tpu.memory_space<vmem>>, vector<1x8x4xbf16>
    %10 = vector.shape_cast %9 : vector<1x8x4xbf16> to vector<8x4xbf16>
    %cst_11 = arith.constant dense<0.000000e+00> : vector<8x384xf32>
    %11 = tpu.matmul %10, %8, %cst_11 {dimension_numbers = #tpu.dot_dimension_numbers<[1], [0], [0], [1], [0, 0, 1, 1], [], []>} : vector<8x4xbf16>, vector<4x384xbf16>, vector<8x384xf32> -> vector<8x384xf32>
    %12 = arith.addf %6, %11 : vector<8x384xf32>
    %c0_12 = arith.constant 0 : index
    %c0_13 = arith.constant 0 : index
    %c2 = arith.constant 2 : index
    %13 = vector.load %arg2[%c0_12, %c0_13, %c2] : memref<1x4x512xbf16, #tpu.memory_space<vmem>>, vector<1x4x384xbf16>
    %14 = vector.shape_cast %13 : vector<1x4x384xbf16> to vector<4x384xbf16>
    %c2_14 = arith.constant 2 : index
    %c0_15 = arith.constant 0 : index
    %c0_16 = arith.constant 0 : index
    %15 = vector.load %arg1[%c2_14, %c0_15, %c0_16] : memref<9x8x4xbf16, #tpu.memory_space<vmem>>, vector<1x8x4xbf16>
    %16 = vector.shape_cast %15 : vector<1x8x4xbf16> to vector<8x4xbf16>
    %cst_17 = arith.constant dense<0.000000e+00> : vector<8x384xf32>
    %17 = tpu.matmul %16, %14, %cst_17 {dimension_numbers = #tpu.dot_dimension_numbers<[1], [0], [0], [1], [0, 0, 1, 1], [], []>} : vector<8x4xbf16>, vector<4x384xbf16>, vector<8x384xf32> -> vector<8x384xf32>
    %18 = arith.addf %12, %17 : vector<8x384xf32>
    %c0_18 = arith.constant 0 : index
    %c0_19 = arith.constant 0 : index
    %c18 = arith.constant 18 : index
    %19 = vector.load %arg2[%c0_18, %c0_19, %c18] : memref<1x4x512xbf16, #tpu.memory_space<vmem>>, vector<1x4x384xbf16>
    %20 = vector.shape_cast %19 : vector<1x4x384xbf16> to vector<4x384xbf16>
    %c3 = arith.constant 3 : index
    %c0_20 = arith.constant 0 : index
    %c0_21 = arith.constant 0 : index
    %21 = vector.load %arg1[%c3, %c0_20, %c0_21] : memref<9x8x4xbf16, #tpu.memory_space<vmem>>, vector<1x8x4xbf16>
    %22 = vector.shape_cast %21 : vector<1x8x4xbf16> to vector<8x4xbf16>
    %cst_22 = arith.constant dense<0.000000e+00> : vector<8x384xf32>
    %23 = tpu.matmul %22, %20, %cst_22 {dimension_numbers = #tpu.dot_dimension_numbers<[1], [0], [0], [1], [0, 0, 1, 1], [], []>} : vector<8x4xbf16>, vector<4x384xbf16>, vector<8x384xf32> -> vector<8x384xf32>
    %24 = arith.addf %18, %23 : vector<8x384xf32>
    %c0_23 = arith.constant 0 : index
    %c0_24 = arith.constant 0 : index
    %c19 = arith.constant 19 : index
    %25 = vector.load %arg2[%c0_23, %c0_24, %c19] : memref<1x4x512xbf16, #tpu.memory_space<vmem>>, vector<1x4x384xbf16>
    %26 = vector.shape_cast %25 : vector<1x4x384xbf16> to vector<4x384xbf16>
    %c4 = arith.constant 4 : index
    %c0_25 = arith.constant 0 : index
    %c0_26 = arith.constant 0 : index
    %27 = vector.load %arg1[%c4, %c0_25, %c0_26] : memref<9x8x4xbf16, #tpu.memory_space<vmem>>, vector<1x8x4xbf16>
    %28 = vector.shape_cast %27 : vector<1x8x4xbf16> to vector<8x4xbf16>
    %cst_27 = arith.constant dense<0.000000e+00> : vector<8x384xf32>
    %29 = tpu.matmul %28, %26, %cst_27 {dimension_numbers = #tpu.dot_dimension_numbers<[1], [0], [0], [1], [0, 0, 1, 1], [], []>} : vector<8x4xbf16>, vector<4x384xbf16>, vector<8x384xf32> -> vector<8x384xf32>
    %30 = arith.addf %24, %29 : vector<8x384xf32>
    %c0_28 = arith.constant 0 : index
    %c0_29 = arith.constant 0 : index
    %c20 = arith.constant 20 : index
    %31 = vector.load %arg2[%c0_28, %c0_29, %c20] : memref<1x4x512xbf16, #tpu.memory_space<vmem>>, vector<1x4x384xbf16>
    %32 = vector.shape_cast %31 : vector<1x4x384xbf16> to vector<4x384xbf16>
    %c5 = arith.constant 5 : index
    %c0_30 = arith.constant 0 : index
    %c0_31 = arith.constant 0 : index
    %33 = vector.load %arg1[%c5, %c0_30, %c0_31] : memref<9x8x4xbf16, #tpu.memory_space<vmem>>, vector<1x8x4xbf16>
    %34 = vector.shape_cast %33 : vector<1x8x4xbf16> to vector<8x4xbf16>
    %cst_32 = arith.constant dense<0.000000e+00> : vector<8x384xf32>
    %35 = tpu.matmul %34, %32, %cst_32 {dimension_numbers = #tpu.dot_dimension_numbers<[1], [0], [0], [1], [0, 0, 1, 1], [], []>} : vector<8x4xbf16>, vector<4x384xbf16>, vector<8x384xf32> -> vector<8x384xf32>
    %36 = arith.addf %30, %35 : vector<8x384xf32>
    %c0_33 = arith.constant 0 : index
    %c0_34 = arith.constant 0 : index
    %c36 = arith.constant 36 : index
    %37 = vector.load %arg2[%c0_33, %c0_34, %c36] : memref<1x4x512xbf16, #tpu.memory_space<vmem>>, vector<1x4x384xbf16>
    %38 = vector.shape_cast %37 : vector<1x4x384xbf16> to vector<4x384xbf16>
    %c6 = arith.constant 6 : index
    %c0_35 = arith.constant 0 : index
    %c0_36 = arith.constant 0 : index
    %39 = vector.load %arg1[%c6, %c0_35, %c0_36] : memref<9x8x4xbf16, #tpu.memory_space<vmem>>, vector<1x8x4xbf16>
    %40 = vector.shape_cast %39 : vector<1x8x4xbf16> to vector<8x4xbf16>
    %cst_37 = arith.constant dense<0.000000e+00> : vector<8x384xf32>
    %41 = tpu.matmul %40, %38, %cst_37 {dimension_numbers = #tpu.dot_dimension_numbers<[1], [0], [0], [1], [0, 0, 1, 1], [], []>} : vector<8x4xbf16>, vector<4x384xbf16>, vector<8x384xf32> -> vector<8x384xf32>
    %42 = arith.addf %36, %41 : vector<8x384xf32>
    %c0_38 = arith.constant 0 : index
    %c0_39 = arith.constant 0 : index
    %c37 = arith.constant 37 : index
    %43 = vector.load %arg2[%c0_38, %c0_39, %c37] : memref<1x4x512xbf16, #tpu.memory_space<vmem>>, vector<1x4x384xbf16>
    %44 = vector.shape_cast %43 : vector<1x4x384xbf16> to vector<4x384xbf16>
    %c7 = arith.constant 7 : index
    %c0_40 = arith.constant 0 : index
    %c0_41 = arith.constant 0 : index
    %45 = vector.load %arg1[%c7, %c0_40, %c0_41] : memref<9x8x4xbf16, #tpu.memory_space<vmem>>, vector<1x8x4xbf16>
    %46 = vector.shape_cast %45 : vector<1x8x4xbf16> to vector<8x4xbf16>
    %cst_42 = arith.constant dense<0.000000e+00> : vector<8x384xf32>
    %47 = tpu.matmul %46, %44, %cst_42 {dimension_numbers = #tpu.dot_dimension_numbers<[1], [0], [0], [1], [0, 0, 1, 1], [], []>} : vector<8x4xbf16>, vector<4x384xbf16>, vector<8x384xf32> -> vector<8x384xf32>
    %48 = arith.addf %42, %47 : vector<8x384xf32>
    %c0_43 = arith.constant 0 : index
    %c0_44 = arith.constant 0 : index
    %c38 = arith.constant 38 : index
    %49 = vector.load %arg2[%c0_43, %c0_44, %c38] : memref<1x4x512xbf16, #tpu.memory_space<vmem>>, vector<1x4x384xbf16>
    %50 = vector.shape_cast %49 : vector<1x4x384xbf16> to vector<4x384xbf16>
    %c8 = arith.constant 8 : index
    %c0_45 = arith.constant 0 : index
    %c0_46 = arith.constant 0 : index
    %51 = vector.load %arg1[%c8, %c0_45, %c0_46] : memref<9x8x4xbf16, #tpu.memory_space<vmem>>, vector<1x8x4xbf16>
    %52 = vector.shape_cast %51 : vector<1x8x4xbf16> to vector<8x4xbf16>
    %cst_47 = arith.constant dense<0.000000e+00> : vector<8x384xf32>
    %53 = tpu.matmul %52, %50, %cst_47 {dimension_numbers = #tpu.dot_dimension_numbers<[1], [0], [0], [1], [0, 0, 1, 1], [], []>} : vector<8x4xbf16>, vector<4x384xbf16>, vector<8x384xf32> -> vector<8x384xf32>
    %54 = arith.addf %48, %53 : vector<8x384xf32>
    %c0_48 = arith.constant 0 : index
    %c0_49 = arith.constant 0 : index
    %55 = vector.load %arg3[%c0_48, %c0_49] : memref<1x384xf32, #tpu.memory_space<vmem>>, vector<1x384xf32>
    %56 = vector.broadcast %55 : vector<1x384xf32> to vector<8x384xf32>
    %57 = arith.mulf %54, %56 : vector<8x384xf32>
    %cst_50 = arith.constant dense<0.000000e+00> : vector<8xf32>
    %58 = vector.multi_reduction <add>, %57, %cst_50 [1] : vector<8x384xf32> to vector<8xf32>
    %59 = vector.shape_cast %58 : vector<8xf32> to vector<8x1xf32>
    %cst_51 = arith.constant 3.906250e-03 : f32
    %60 = vector.broadcast %cst_51 : f32 to vector<8x1xf32>
    %61 = arith.mulf %59, %60 : vector<8x1xf32>
    %62 = vector.broadcast %61 : vector<8x1xf32> to vector<8x384xf32>
    %63 = arith.subf %54, %62 : vector<8x384xf32>
    %64 = vector.broadcast %55 : vector<1x384xf32> to vector<8x384xf32>
    %65 = arith.mulf %63, %64 : vector<8x384xf32>
    %c0_52 = arith.constant 0 : index
    %c0_53 = arith.constant 0 : index
    %c0_54 = arith.constant 0 : index
    %66 = vector.load %arg5[%c0_52, %c0_53, %c0_54] : memref<1x8x1xf32, #tpu.memory_space<vmem>>, vector<1x8x1xf32>
    %67 = vector.shape_cast %66 : vector<1x8x1xf32> to vector<8x1xf32>
    %68 = vector.shape_cast %59 : vector<8x1xf32> to vector<1x8x1xf32>
    tpu.vector_store %arg5[%c0_52, %c0_53, %c0_54], %68 {strides = array<i32>} : memref<1x8x1xf32, #tpu.memory_space<vmem>>, vector<1x8x1xf32>,
    %69 = arith.mulf %65, %65 : vector<8x384xf32>
    %cst_55 = arith.constant dense<0.000000e+00> : vector<8xf32>
    %70 = vector.multi_reduction <add>, %69, %cst_55 [1] : vector<8x384xf32> to vector<8xf32>
    %71 = vector.shape_cast %70 : vector<8xf32> to vector<8x1xf32>
    %c0_56 = arith.constant 0 : index
    %c0_57 = arith.constant 0 : index
    %c0_58 = arith.constant 0 : index
    %72 = vector.load %arg6[%c0_56, %c0_57, %c0_58] : memref<1x8x1xf32, #tpu.memory_space<vmem>>, vector<1x8x1xf32>
    %73 = vector.shape_cast %72 : vector<1x8x1xf32> to vector<8x1xf32>
    %74 = vector.shape_cast %71 : vector<8x1xf32> to vector<1x8x1xf32>
    tpu.vector_store %arg6[%c0_56, %c0_57, %c0_58], %74 {strides = array<i32>} : memref<1x8x1xf32, #tpu.memory_space<vmem>>, vector<1x8x1xf32>,
    %75 = vector.extract_strided_slice %54 {offsets = [0, 0], sizes = [8, 16], strides = [1, 1]} : vector<8x384xf32> to vector<8x16xf32>
    %76 = arith.truncf %75 : vector<8x16xf32> to vector<8x16xbf16>
    %c0_59 = arith.constant 0 : index
    %c0_60 = arith.constant 0 : index
    %c0_61 = arith.constant 0 : index
    %77 = vector.load %arg4[%c0_59, %c0_60, %c0_61] : memref<1x8x256xbf16, #tpu.memory_space<vmem>>, vector<1x8x16xbf16>
    %78 = vector.shape_cast %77 : vector<1x8x16xbf16> to vector<8x16xbf16>
    %79 = vector.shape_cast %76 : vector<8x16xbf16> to vector<1x8x16xbf16>
    tpu.vector_store %arg4[%c0_59, %c0_60, %c0_61], %79 {strides = array<i32>} : memref<1x8x256xbf16, #tpu.memory_space<vmem>>, vector<1x8x16xbf16>,
    %80 = vector.extract_strided_slice %54 {offsets = [0, 18], sizes = [8, 16], strides = [1, 1]} : vector<8x384xf32> to vector<8x16xf32>
    %81 = arith.truncf %80 : vector<8x16xf32> to vector<8x16xbf16>
    %c0_62 = arith.constant 0 : index
    %c0_63 = arith.constant 0 : index
    %c16 = arith.constant 16 : index
    %82 = vector.load %arg4[%c0_62, %c0_63, %c16] : memref<1x8x256xbf16, #tpu.memory_space<vmem>>, vector<1x8x16xbf16>
    %83 = vector.shape_cast %82 : vector<1x8x16xbf16> to vector<8x16xbf16>
    %84 = vector.shape_cast %81 : vector<8x16xbf16> to vector<1x8x16xbf16>
    tpu.vector_store %arg4[%c0_62, %c0_63, %c16], %84 {strides = array<i32>} : memref<1x8x256xbf16, #tpu.memory_space<vmem>>, vector<1x8x16xbf16>,
    %85 = vector.extract_strided_slice %54 {offsets = [0, 36], sizes = [8, 16], strides = [1, 1]} : vector<8x384xf32> to vector<8x16xf32>
    %86 = arith.truncf %85 : vector<8x16xf32> to vector<8x16xbf16>
    %c0_64 = arith.constant 0 : index
    %c0_65 = arith.constant 0 : index
    %c32 = arith.constant 32 : index
    %87 = vector.load %arg4[%c0_64, %c0_65, %c32] : memref<1x8x256xbf16, #tpu.memory_space<vmem>>, vector<1x8x16xbf16>
    %88 = vector.shape_cast %87 : vector<1x8x16xbf16> to vector<8x16xbf16>
    %89 = vector.shape_cast %86 : vector<8x16xbf16> to vector<1x8x16xbf16>
    tpu.vector_store %arg4[%c0_64, %c0_65, %c32], %89 {strides = array<i32>} : memref<1x8x256xbf16, #tpu.memory_space<vmem>>, vector<1x8x16xbf16>,
    %90 = vector.extract_strided_slice %54 {offsets = [0, 54], sizes = [8, 16], strides = [1, 1]} : vector<8x384xf32> to vector<8x16xf32>
    %91 = arith.truncf %90 : vector<8x16xf32> to vector<8x16xbf16>
    %c0_66 = arith.constant 0 : index
    %c0_67 = arith.constant 0 : index
    %c48 = arith.constant 48 : index
    %92 = vector.load %arg4[%c0_66, %c0_67, %c48] : memref<1x8x256xbf16, #tpu.memory_space<vmem>>, vector<1x8x16xbf16>
    %93 = vector.shape_cast %92 : vector<1x8x16xbf16> to vector<8x16xbf16>
    %94 = vector.shape_cast %91 : vector<8x16xbf16> to vector<1x8x16xbf16>
    tpu.vector_store %arg4[%c0_66, %c0_67, %c48], %94 {strides = array<i32>} : memref<1x8x256xbf16, #tpu.memory_space<vmem>>, vector<1x8x16xbf16>,
    %95 = vector.extract_strided_slice %54 {offsets = [0, 72], sizes = [8, 16], strides = [1, 1]} : vector<8x384xf32> to vector<8x16xf32>
    %96 = arith.truncf %95 : vector<8x16xf32> to vector<8x16xbf16>
    %c0_68 = arith.constant 0 : index
    %c0_69 = arith.constant 0 : index
    %c64 = arith.constant 64 : index
    %97 = vector.load %arg4[%c0_68, %c0_69, %c64] : memref<1x8x256xbf16, #tpu.memory_space<vmem>>, vector<1x8x16xbf16>
    %98 = vector.shape_cast %97 : vector<1x8x16xbf16> to vector<8x16xbf16>
    %99 = vector.shape_cast %96 : vector<8x16xbf16> to vector<1x8x16xbf16>
    tpu.vector_store %arg4[%c0_68, %c0_69, %c64], %99 {strides = array<i32>} : memref<1x8x256xbf16, #tpu.memory_space<vmem>>, vector<1x8x16xbf16>,
    %100 = vector.extract_strided_slice %54 {offsets = [0, 90], sizes = [8, 16], strides = [1, 1]} : vector<8x384xf32> to vector<8x16xf32>
    %101 = arith.truncf %100 : vector<8x16xf32> to vector<8x16xbf16>
    %c0_70 = arith.constant 0 : index
    %c0_71 = arith.constant 0 : index
    %c80 = arith.constant 80 : index
    %102 = vector.load %arg4[%c0_70, %c0_71, %c80] : memref<1x8x256xbf16, #tpu.memory_space<vmem>>, vector<1x8x16xbf16>
    %103 = vector.shape_cast %102 : vector<1x8x16xbf16> to vector<8x16xbf16>
    %104 = vector.shape_cast %101 : vector<8x16xbf16> to vector<1x8x16xbf16>
    tpu.vector_store %arg4[%c0_70, %c0_71, %c80], %104 {strides = array<i32>} : memref<1x8x256xbf16, #tpu.memory_space<vmem>>, vector<1x8x16xbf16>,
    %105 = vector.extract_strided_slice %54 {offsets = [0, 108], sizes = [8, 16], strides = [1, 1]} : vector<8x384xf32> to vector<8x16xf32>
    %106 = arith.truncf %105 : vector<8x16xf32> to vector<8x16xbf16>
    %c0_72 = arith.constant 0 : index
    %c0_73 = arith.constant 0 : index
    %c96 = arith.constant 96 : index
    %107 = vector.load %arg4[%c0_72, %c0_73, %c96] : memref<1x8x256xbf16, #tpu.memory_space<vmem>>, vector<1x8x16xbf16>
    %108 = vector.shape_cast %107 : vector<1x8x16xbf16> to vector<8x16xbf16>
    %109 = vector.shape_cast %106 : vector<8x16xbf16> to vector<1x8x16xbf16>
    tpu.vector_store %arg4[%c0_72, %c0_73, %c96], %109 {strides = array<i32>} : memref<1x8x256xbf16, #tpu.memory_space<vmem>>, vector<1x8x16xbf16>,
    %110 = vector.extract_strided_slice %54 {offsets = [0, 126], sizes = [8, 16], strides = [1, 1]} : vector<8x384xf32> to vector<8x16xf32>
    %111 = arith.truncf %110 : vector<8x16xf32> to vector<8x16xbf16>
    %c0_74 = arith.constant 0 : index
    %c0_75 = arith.constant 0 : index
    %c112 = arith.constant 112 : index
    %112 = vector.load %arg4[%c0_74, %c0_75, %c112] : memref<1x8x256xbf16, #tpu.memory_space<vmem>>, vector<1x8x16xbf16>
    %113 = vector.shape_cast %112 : vector<1x8x16xbf16> to vector<8x16xbf16>
    %114 = vector.shape_cast %111 : vector<8x16xbf16> to vector<1x8x16xbf16>
    tpu.vector_store %arg4[%c0_74, %c0_75, %c112], %114 {strides = array<i32>} : memref<1x8x256xbf16, #tpu.memory_space<vmem>>, vector<1x8x16xbf16>,
    %115 = vector.extract_strided_slice %54 {offsets = [0, 144], sizes = [8, 16], strides = [1, 1]} : vector<8x384xf32> to vector<8x16xf32>
    %116 = arith.truncf %115 : vector<8x16xf32> to vector<8x16xbf16>
    %c0_76 = arith.constant 0 : index
    %c0_77 = arith.constant 0 : index
    %c128 = arith.constant 128 : index
    %117 = vector.load %arg4[%c0_76, %c0_77, %c128] : memref<1x8x256xbf16, #tpu.memory_space<vmem>>, vector<1x8x16xbf16>
    %118 = vector.shape_cast %117 : vector<1x8x16xbf16> to vector<8x16xbf16>
    %119 = vector.shape_cast %116 : vector<8x16xbf16> to vector<1x8x16xbf16>
    tpu.vector_store %arg4[%c0_76, %c0_77, %c128], %119 {strides = array<i32>} : memref<1x8x256xbf16, #tpu.memory_space<vmem>>, vector<1x8x16xbf16>,
    %120 = vector.extract_strided_slice %54 {offsets = [0, 162], sizes = [8, 16], strides = [1, 1]} : vector<8x384xf32> to vector<8x16xf32>
    %121 = arith.truncf %120 : vector<8x16xf32> to vector<8x16xbf16>
    %c0_78 = arith.constant 0 : index
    %c0_79 = arith.constant 0 : index
    %c144 = arith.constant 144 : index
    %122 = vector.load %arg4[%c0_78, %c0_79, %c144] : memref<1x8x256xbf16, #tpu.memory_space<vmem>>, vector<1x8x16xbf16>
    %123 = vector.shape_cast %122 : vector<1x8x16xbf16> to vector<8x16xbf16>
    %124 = vector.shape_cast %121 : vector<8x16xbf16> to vector<1x8x16xbf16>
    tpu.vector_store %arg4[%c0_78, %c0_79, %c144], %124 {strides = array<i32>} : memref<1x8x256xbf16, #tpu.memory_space<vmem>>, vector<1x8x16xbf16>,
    %125 = vector.extract_strided_slice %54 {offsets = [0, 180], sizes = [8, 16], strides = [1, 1]} : vector<8x384xf32> to vector<8x16xf32>
    %126 = arith.truncf %125 : vector<8x16xf32> to vector<8x16xbf16>
    %c0_80 = arith.constant 0 : index
    %c0_81 = arith.constant 0 : index
    %c160 = arith.constant 160 : index
    %127 = vector.load %arg4[%c0_80, %c0_81, %c160] : memref<1x8x256xbf16, #tpu.memory_space<vmem>>, vector<1x8x16xbf16>
    %128 = vector.shape_cast %127 : vector<1x8x16xbf16> to vector<8x16xbf16>
    %129 = vector.shape_cast %126 : vector<8x16xbf16> to vector<1x8x16xbf16>
    tpu.vector_store %arg4[%c0_80, %c0_81, %c160], %129 {strides = array<i32>} : memref<1x8x256xbf16, #tpu.memory_space<vmem>>, vector<1x8x16xbf16>,
    %130 = vector.extract_strided_slice %54 {offsets = [0, 198], sizes = [8, 16], strides = [1, 1]} : vector<8x384xf32> to vector<8x16xf32>
    %131 = arith.truncf %130 : vector<8x16xf32> to vector<8x16xbf16>
    %c0_82 = arith.constant 0 : index
    %c0_83 = arith.constant 0 : index
    %c176 = arith.constant 176 : index
    %132 = vector.load %arg4[%c0_82, %c0_83, %c176] : memref<1x8x256xbf16, #tpu.memory_space<vmem>>, vector<1x8x16xbf16>
    %133 = vector.shape_cast %132 : vector<1x8x16xbf16> to vector<8x16xbf16>
    %134 = vector.shape_cast %131 : vector<8x16xbf16> to vector<1x8x16xbf16>
    tpu.vector_store %arg4[%c0_82, %c0_83, %c176], %134 {strides = array<i32>} : memref<1x8x256xbf16, #tpu.memory_space<vmem>>, vector<1x8x16xbf16>,
    %135 = vector.extract_strided_slice %54 {offsets = [0, 216], sizes = [8, 16], strides = [1, 1]} : vector<8x384xf32> to vector<8x16xf32>
    %136 = arith.truncf %135 : vector<8x16xf32> to vector<8x16xbf16>
    %c0_84 = arith.constant 0 : index
    %c0_85 = arith.constant 0 : index
    %c192 = arith.constant 192 : index
    %137 = vector.load %arg4[%c0_84, %c0_85, %c192] : memref<1x8x256xbf16, #tpu.memory_space<vmem>>, vector<1x8x16xbf16>
    %138 = vector.shape_cast %137 : vector<1x8x16xbf16> to vector<8x16xbf16>
    %139 = vector.shape_cast %136 : vector<8x16xbf16> to vector<1x8x16xbf16>
    tpu.vector_store %arg4[%c0_84, %c0_85, %c192], %139 {strides = array<i32>} : memref<1x8x256xbf16, #tpu.memory_space<vmem>>, vector<1x8x16xbf16>,
    %140 = vector.extract_strided_slice %54 {offsets = [0, 234], sizes = [8, 16], strides = [1, 1]} : vector<8x384xf32> to vector<8x16xf32>
    %141 = arith.truncf %140 : vector<8x16xf32> to vector<8x16xbf16>
    %c0_86 = arith.constant 0 : index
    %c0_87 = arith.constant 0 : index
    %c208 = arith.constant 208 : index
    %142 = vector.load %arg4[%c0_86, %c0_87, %c208] : memref<1x8x256xbf16, #tpu.memory_space<vmem>>, vector<1x8x16xbf16>
    %143 = vector.shape_cast %142 : vector<1x8x16xbf16> to vector<8x16xbf16>
    %144 = vector.shape_cast %141 : vector<8x16xbf16> to vector<1x8x16xbf16>
    tpu.vector_store %arg4[%c0_86, %c0_87, %c208], %144 {strides = array<i32>} : memref<1x8x256xbf16, #tpu.memory_space<vmem>>, vector<1x8x16xbf16>,
    %145 = vector.extract_strided_slice %54 {offsets = [0, 252], sizes = [8, 16], strides = [1, 1]} : vector<8x384xf32> to vector<8x16xf32>
    %146 = arith.truncf %145 : vector<8x16xf32> to vector<8x16xbf16>
    %c0_88 = arith.constant 0 : index
    %c0_89 = arith.constant 0 : index
    %c224 = arith.constant 224 : index
    %147 = vector.load %arg4[%c0_88, %c0_89, %c224] : memref<1x8x256xbf16, #tpu.memory_space<vmem>>, vector<1x8x16xbf16>
    %148 = vector.shape_cast %147 : vector<1x8x16xbf16> to vector<8x16xbf16>
    %149 = vector.shape_cast %146 : vector<8x16xbf16> to vector<1x8x16xbf16>
    tpu.vector_store %arg4[%c0_88, %c0_89, %c224], %149 {strides = array<i32>} : memref<1x8x256xbf16, #tpu.memory_space<vmem>>, vector<1x8x16xbf16>,
    %150 = vector.extract_strided_slice %54 {offsets = [0, 270], sizes = [8, 16], strides = [1, 1]} : vector<8x384xf32> to vector<8x16xf32>
    %151 = arith.truncf %150 : vector<8x16xf32> to vector<8x16xbf16>
    %c0_90 = arith.constant 0 : index
    %c0_91 = arith.constant 0 : index
    %c240 = arith.constant 240 : index
    %152 = vector.load %arg4[%c0_90, %c0_91, %c240] : memref<1x8x256xbf16, #tpu.memory_space<vmem>>, vector<1x8x16xbf16>
    %153 = vector.shape_cast %152 : vector<1x8x16xbf16> to vector<8x16xbf16>
    %154 = vector.shape_cast %151 : vector<8x16xbf16> to vector<1x8x16xbf16>
    tpu.vector_store %arg4[%c0_90, %c0_91, %c240], %154 {strides = array<i32>} : memref<1x8x256xbf16, #tpu.memory_space<vmem>>, vector<1x8x16xbf16>,
    return
  }
  func.func @transform_0(%arg0: i32) -> (i32, i32, i32) {
    %c0_i32 = arith.constant 0 : i32
    %c0_i32_0 = arith.constant 0 : i32
    %c0_i32_1 = arith.constant 0 : i32
    %c0_i32_2 = arith.constant 0 : i32
    return %c0_i32, %c0_i32_0, %c0_i32_1 : i32, i32, i32
  }
  func.func @transform_1(%arg0: i32) -> (i32, i32, i32) {
    %c0_i32 = arith.constant 0 : i32
    %c0_i32_0 = arith.constant 0 : i32
    %c0_i32_1 = arith.constant 0 : i32
    return %arg0, %c0_i32, %c0_i32_0 : i32, i32, i32
  }
  func.func @transform_2(%arg0: i32) -> (i32, i32) {
    %c0_i32 = arith.constant 0 : i32
    %c0_i32_0 = arith.constant 0 : i32
    %c0_i32_1 = arith.constant 0 : i32
    return %c0_i32, %c0_i32_0 : i32, i32
  }
  func.func @transform_3(%arg0: i32) -> (i32, i32, i32) {
    %c0_i32 = arith.constant 0 : i32
    %c0_i32_0 = arith.constant 0 : i32
    %c0_i32_1 = arith.constant 0 : i32
    return %arg0, %c0_i32, %c0_i32_0 : i32, i32, i32
  }
  func.func @transform_4(%arg0: i32) -> (i32, i32, i32) {
    %c0_i32 = arith.constant 0 : i32
    %c0_i32_0 = arith.constant 0 : i32
    %c0_i32_1 = arith.constant 0 : i32
    return %arg0, %c0_i32, %c0_i32_0 : i32, i32, i32
  }
  func.func @transform_5(%arg0: i32) -> (i32, i32, i32) {
    %c0_i32 = arith.constant 0 : i32
    %c0_i32_0 = arith.constant 0 : i32
    %c0_i32_1 = arith.constant 0 : i32
    return %arg0, %c0_i32, %c0_i32_0 : i32, i32, i32
  }
}

</mosaic_0001>

<bundles_post_ra>
// kernel: tpu_custom_call.1
= control target key start
LH: loop header
LB: loop body
LE: loop exit
PB: predicated region body
PF: predicated region fallthrough
CT: control target
= control target key end

     0   :  { %11 = vsyncpa [#allocation3], 0  ;;  %s2384_s0 = inlined_call_operand.vmem [shape: bf16[9,8,4], index: 0, kind: input, shape index: {}]   ;;  %s2385_s1 = inlined_call_operand.vmem [shape: bf16[2,4,512], index: 1, kind: input, shape index: {}]   ;;  %s2386_s2 = inlined_call_operand.vmem [shape: f32[1,384], index: 2, kind: input, shape index: {}]   ;;  %s2387_s3 = inlined_call_operand.hbm [shape: bf16[2,8,256], index: 3, kind: output, shape index: {0}]   ;;  %s2388_s4 = inlined_call_operand.vmem [shape: f32[2,8,1], index: 4, kind: output, shape index: {1}]   ;;  %s2389_s5 = inlined_call_operand.vmem [shape: f32[2,8,1], index: 5, kind: output, shape index: {2}]  }
   0x1   :  { %13 = vsyncpa [#allocation3 + $0x1], 0  ;;  %s2035_s18 = smov 0   ;;  %s2037_s19 = smov 0  }
   0x2   :  { %s2039_s20 = smov 0   ;;  %s2041_s21 = smov 0  }
   0x3 LB: > { %s2056_s22 = sadd.s32 4294967295, %s1978_s21   ;;  %s1654_s23 = sadd.s32 4294967294, %s1978_s21   ;;  %s1978_s21 = sphi %s2041_s21, %s2395_s21   ;;  %s1974_s20 = sphi %s2039_s20, %s2394_s20   ;;  %s1970_s19 = sphi %s2037_s19, %s2393_s19   ;;  %s1966_s18 = sphi %s2035_s18, %s2392_s18  }
   0x4   : > { %s2060_s24 = sadd.s32 1, %s1978_s21   ;;  %s94_s25 = sadd.s32 1, %s1974_s20 }
   0x5   : > { %s91_s26 = ssub.s32 %s1978_s21, %s2060_s24  ;;  %p104_p0 = scmp.ne.s32.totalorder %s1974_s20, %s1970_s19 }
   0x6   : > { %p92_p1 = scmp.eq.s32.totalorder %s91_s26, 0  ;;  %p105_p2 = scmp.eq.s32.totalorder %s2056_s22, 1 }
   0x7   : > { %p110_p3 = scmp.ne.s32.totalorder %s1970_s19, %s1966_s18  ;;  %p111_p4 = scmp.eq.s32.totalorder %s1654_s23, 1 }
   0x8   : > { %s2071_s27 = scalar_select %p92_p1, %s1974_s20, %s94_s25  }
   0x9   : > { %p2073_p5 = por %p105_p2, %p104_p0  ;;  %p2077_p6 = por %p111_p4, %p110_p3 }
   0xa   : > { %p1657_p7 = scmp.ge.s32.totalorder %s1978_s21, 1  ;;  %p195_p8 = scmp.lt.s32.totalorder %s1978_s21, 3 }
   0xc   : > { %p196_p9 = pnand %p1657_p7, %p195_p8 }
   0xd   : > { %p231_p10 = scmp.lt.s32.totalorder (!%p196_p9), %s2056_s22, 1  ;;  %v255_v0 = vlaneseq (!%p196_p9)  ;;  %v1980_v1 = vmov (!%p196_p9), 1983009808   ;;  %v1981_v5 = vmov (!%p196_p9), 0.0   ;;  %v1982_v6 = vmov (!%p196_p9), 0   ;;  %s1984_s10 = smov (!%p196_p9), 127  }
   0xe   : > { %199 = sbr.rel (%p196_p9) target bundleno = 782 (0x30e), region = 32  ;;  %v253_v2 = vunpack.c.l.s4 (!%p196_p9), %v1980_v1  ;;  %1733 = vmatprep.subr.bf16.mxu1 (!%p196_p9), %v1981_v5  ;;  %326 = vmatprep.mubr.bf16.mxu0 (!%p196_p9), %v1982_v6  ;;  %vm1983_vm0 = vmmov (!%p196_p9), 0   ;;  %s1985_s11 = smov (!%p196_p9), 126   ;;  %vm276_vm1 = vcmask (!%p196_p9), 1039360   ;;  %vm284_vm2 = vcmask (!%p196_p9), 1041408  }
   0xf   : > { %v2085_v3 = vshrl.u32 (!%p196_p9), %v255_v0, 7  ;;  %1735 = vmatprep.mubr.msk.bf16.mxu1 (!%p196_p9), %vm1983_vm0, %v1981_v5  ;;  %s1986_s12 = smov (!%p196_p9), 110   ;;  %s1987_s13 = smov (!%p196_p9), 109   ;;  %v1663_v27 = vld [vmem:[%s2384_s0 + $0x4] sm:$0xf] (!%p196_p9)  ;;  %vm280_vm3 = vcmask (!%p196_p9), 31744  }
  0x10   : > { %v254_v4 = vunpack.c.0.s8 (!%p196_p9), %v253_v2  ;;  %s1988_s14 = smov (!%p196_p9), 108   ;;  %s1989_s15 = smov (!%p196_p9), 92   ;;  %vm514_vm4 = vcmask (!%p196_p9), 1031168   ;;  %vm643_vm5 = vcmask (!%p196_p9), 900096   ;;  %v246_v40 = vld [vmem:[%s2384_s0] sm:$0xf] (!%p196_p9) }
  0x11   : > { %s1990_s16 = smov (!%p196_p9), 91   ;;  %s1991_s17 = smov (!%p196_p9), 90   ;;  %vm772_vm6 = vcmask (!%p196_p9), 891904   ;;  %v1670_v51 = vld [vmem:[%s2384_s0 + $0x8] sm:$0xf] (!%p196_p9)  ;;  %vm901_vm7 = vcmask (!%p196_p9), 883712  }
  0x12   : > { %v257_v7 = vsub.s32 (!%p196_p9), %v254_v4, %v2085_v3  ;;  %v1674_v61 = vld [vmem:[%s2384_s0 + $0xc] sm:$0xf] (!%p196_p9)  ;;  %vm1030_vm8 = vcmask (!%p196_p9), 752640   ;;  %vm1159_vm9 = vcmask (!%p196_p9), 744448   ;;  %vm1288_vm10 = vcmask (!%p196_p9), 736256   ;;  %s1994_s23 = smov (!%p196_p9), 100  }
  0x13   : > { %vm1430_vm11 = vcmask (!%p196_p9), 125952   ;;  %s1995_s25 = smov (!%p196_p9), 114   ;;  %s1996_s26 = smov (!%p196_p9), 118   ;;  %vm1438_vm12 = vcmask (!%p196_p9), 257152   ;;  %vm1443_vm13 = vcmask (!%p196_p9), 388352   ;;  %vm1448_vm14 = vcmask (!%p196_p9), 519552  }
  0x14   : > { %s1998_s7 = smov (!%p196_p9), 106   ;;  %s1999_s8 = smov (!%p196_p9), 120   ;;  %vm1419_vm15 = vcmask (!%p196_p9), 7168  }
  0x15   : > { %s232_s30 = scalar_select %p231_p10, %s2056_s22, 1 }
  0x17   : > { %s2089_s6 = sshll.u32 %s232_s30, 3  ;;  %s1997_s30 = smov 112  }
  0x18   : > { %s235_s9 = scalar_lea.vmem %s2385_s1, %s2089_s6 }
  0x19   : > { %v247_v8 = vld [vmem:[%s235_s9] sm:$0xff] }
  0x1a   : > { %v245_v9 = vld [vmem:[%s235_s9] sm:$0x3f]  ;;  %v258_v10 = vrot.slane %v247_v8, %v257_v7  ;;  %v251_v11 = vcombine.high %v247_v8, %v247_v8  ;;  %s2000_s9 = smov 104  }
  0x1b   : > { %v2098_v12 = vrot.slane %v245_v9, %v257_v7  ;;  %v376_v13 = vcombine.high %v245_v9, %v245_v9 }
  0x1c   : > { %268 = vrot.lane.b32.xlu0 %v258_v10, %s1984_s10  ;;  %v266_v14 = vcombine.high %v258_v10, %v258_v10  ;;  %v265_v15 = vrot.slane %v251_v11, %v257_v7 }
  0x1d   : > { %v390_v16 = vrot.slane %v376_v13, %v257_v7  ;;  %v391_v21 = vcombine.high %v2098_v12, %v2098_v12  ;;  %v396_v29 = vsel %vm284_vm2, %v2098_v12, 0 }
  0x1e   : > { %272 = vrot.lane.b32.xlu1 %v265_v15, %s1984_s10  ;;  %v267_v17 = vcombine.high %v265_v15, %v265_v15 }
  0x1f   : > { %v402_v31 = vsel %vm284_vm2, %v390_v16, 0 }
  0x20   : > { %270 = vrot.lane.b32.xlu0 %v266_v14, %s1984_s10 }
  0x22   : > { %274 = vrot.lane.b32.xlu1 %v267_v17, %s1984_s10  ;;  %s2001_s10 = smov 102  }
  0x24   : > { %506 = vrot.lane.b32.xlu0 %v258_v10, %s1985_s11 }
  0x26   : > { %508 = vrot.lane.b32.xlu1 %v266_v14, %s1985_s11 }
  0x28   : > { %510 = vrot.lane.b32.xlu0 %v265_v15, %s1985_s11 }
  0x2a   : > { %512 = vrot.lane.b32.xlu1 %v267_v17, %s1985_s11 }
  0x2c   : > { %635 = vrot.lane.b32.xlu0 %v258_v10, %s1986_s12 }
  0x2e   : > { %637 = vrot.lane.b32.xlu1 %v266_v14, %s1986_s12 }
  0x30   : > { %639 = vrot.lane.b32.xlu0 %v265_v15, %s1986_s12 }
  0x32   : > { %641 = vrot.lane.b32.xlu1 %v267_v17, %s1986_s12 }
  0x34   : > { %764 = vrot.lane.b32.xlu0 %v258_v10, %s1987_s13 }
  0x36   : > { %766 = vrot.lane.b32.xlu1 %v266_v14, %s1987_s13 }
  0x38   : > { %768 = vrot.lane.b32.xlu0 %v265_v15, %s1987_s13 }
  0x3a   : > { %770 = vrot.lane.b32.xlu1 %v267_v17, %s1987_s13  ;;  %s216_s13 = sand.u32 1, %s1970_s19  }
  0x3c   : > { %893 = vrot.lane.b32.xlu0 %v258_v10, %s1988_s14 }
  0x3e   : > { %895 = vrot.lane.b32.xlu1 %v266_v14, %s1988_s14 }
  0x40   : > { %897 = vrot.lane.b32.xlu0 %v265_v15, %s1988_s14 }
  0x42   : > { %899 = vrot.lane.b32.xlu1 %v267_v17, %s1988_s14 }
  0x44   : > { %1022 = vrot.lane.b32.xlu0 %v258_v10, %s1989_s15 }
  0x46   : > { %1024 = vrot.lane.b32.xlu1 %v266_v14, %s1989_s15 }
  0x48   : > { %1026 = vrot.lane.b32.xlu0 %v265_v15, %s1989_s15 }
  0x4a   : > { %1028 = vrot.lane.b32.xlu1 %v267_v17, %s1989_s15  ;;  %s1658_s15 = sshll.u32 %s216_s13, 3 }
  0x4c   : > { %1151 = vrot.lane.b32.xlu0 %v258_v10, %s1990_s16 }
  0x4e   : > { %1153 = vrot.lane.b32.xlu1 %v266_v14, %s1990_s16 }
  0x50   : > { %1155 = vrot.lane.b32.xlu0 %v265_v15, %s1990_s16 }
  0x52   : > { %1157 = vrot.lane.b32.xlu1 %v267_v17, %s1990_s16  ;;  %s2277_s16 = scalar_lea.vmem [#allocation2], %s1658_s15  ;;  %s2002_s15 = smov 98  }
  0x54   : > { %1280 = vrot.lane.b32.xlu0 %v258_v10, %s1991_s17  ;;  %v1678_v10 = vld [vmem:[%s2384_s0 + $0x10] sm:$0xf] }
  0x56   : > { %1282 = vrot.lane.b32.xlu1 %v266_v14, %s1991_s17 }
  0x58   : > { %1284 = vrot.lane.b32.xlu0 %v265_v15, %s1991_s17 }
  0x5a   : > { %1286 = vrot.lane.b32.xlu1 %v267_v17, %s1991_s17  ;;  %s1992_s17 = smov 124  }
  0x8e   : > { %v269_v18 = vpop.permute.xlu0 %268 }
  0x90   : > { %v273_v19 = vpop.permute.xlu1 %272 }
  0x92   : > { %v271_v20 = vpop.permute.xlu0 %270 }
  0x93   : > { %v278_v22 = vsel %vm276_vm1, %v271_v20, %v273_v19  ;;  %v277_v23 = vsel %vm276_vm1, %v269_v18, %v271_v20  ;;  %v1682_v20 = vld [vmem:[%s2384_s0 + $0x14] sm:$0xf] }
  0x94   : > { %1664 = vmatprep.subr.msk.bf16.mxu0 %vm284_vm2, %v278_v22  ;;  %v275_v24 = vpop.permute.xlu1 %274  ;;  %v286_v25 = vsel %vm284_vm2, %v277_v23, 0 }
  0x95   : > { %295 = vmatpush1.bf16.msra.mxu0 %v286_v25  ;;  %v279_v26 = vsel %vm276_vm1, %v273_v19, %v275_v24  ;;  %vm1458_vm1 = vcmask 781952  }
  0x96   : > { %v292_v28 = vsel %vm284_vm2, %v279_v26, 0  ;;  %1667 = vmatprep.subr.msk.bf16.mxu0 %vm284_vm2, %v391_v21  ;;  %v507_v30 = vpop.permute.xlu0 %506 }
  0x97   : > { %1734 = vmatpush3.bf16.msra.mxu1 %v292_v28 }
  0x98   : > { %1665 = vmatmul.mubr.msk.bf16.vlgmr.msra.gmra.mrb[0].mxu0 %vm280_vm3, %v1663_v27  ;;  %1739 = vmatprep.subr.bf16.mxu1 %v1981_v5  ;;  %v509_v32 = vpop.permute.xlu1 %508 }
  0x99   : > { %405 = vmatpush1.bf16.msra.mxu0 %v396_v29  ;;  %436 = vmatprep.mubr.bf16.mxu0 %v1982_v6  ;;  %v515_v37 = vsel %vm514_vm4, %v507_v30, %v509_v32  ;;  %v1686_v30 = vld [vmem:[%s2384_s0 + $0x18] sm:$0xf] }
  0x9a   : > { %1736 = vmatmul.mubr.msk.bf16.vlgmr.msra.gmra.mrb[0].mxu1 %vm280_vm3, %v1663_v27  ;;  %v511_v33 = vpop.permute.xlu0 %510  ;;  %v522_v41 = vsel %vm284_vm2, %v515_v37, 0  ;;  %v1690_v37 = vld [vmem:[%s2384_s0 + $0x1c] sm:$0xf] }
  0x9b   : > { %1740 = vmatpush3.bf16.msra.mxu1 %v402_v31  ;;  %v516_v34 = vsel %vm514_vm4, %v509_v32, %v511_v33  ;;  %1741 = vmatprep.mubr.msk.bf16.mxu1 %vm1983_vm0, %v1981_v5 }
  0x9c   : > { %v513_v35 = vpop.permute.xlu1 %512  ;;  %1671 = vmatprep.subr.msk.bf16.mxu0 %vm284_vm2, %v516_v34  ;;  %1745 = vmatprep.subr.bf16.mxu1 %v1981_v5 }
  0x9d   : > { %v517_v39 = vsel %vm514_vm4, %v511_v33, %v513_v35  ;;  %vm1475_vm4 = vcmask 1044352  }
  0x9e   : > { %v636_v36 = vpop.permute.xlu0 %635  ;;  %v528_v44 = vsel %vm284_vm2, %v517_v39, 0 }
  0xa0   : > { %v638_v38 = vpop.permute.xlu1 %637 }
  0xa1   : > { %v644_v47 = vsel %vm643_vm5, %v636_v36, %v638_v38 }
  0xa2   : > { %v640_v42 = vpop.permute.xlu0 %639  ;;  %v651_v52 = vsel %vm284_vm2, %v644_v47, 0 }
  0xa3   : > { %v645_v43 = vsel %vm643_vm5, %v638_v38, %v640_v42 }
  0xa4   : > { %1668 = vmatmul.mubr.msk.bf16.vlgmr.msra.gmra.mrb[0].mxu0 %vm280_vm3, %v246_v40  ;;  %v642_v46 = vpop.permute.xlu1 %641 }
  0xa5   : > { %531 = vmatpush1.bf16.msra.mxu0 %v522_v41  ;;  %562 = vmatprep.mubr.bf16.mxu0 %v1982_v6  ;;  %v646_v50 = vsel %vm643_vm5, %v640_v42, %v642_v46  ;;  %v1392_v41 = vsub.s32 0, %v2085_v3  ;;  %v1396_v42 = vsub.s32 1, %v2085_v3  ;;  %vm1472_vm5 = vcmask 932864  }
  0xa6   : > { %1742 = vmatmul.mubr.msk.bf16.vlgmr.msra.gmra.mrb[0].mxu1 %vm280_vm3, %v246_v40  ;;  %1675 = vmatprep.subr.msk.bf16.mxu0 %vm284_vm2, %v645_v43  ;;  %v765_v45 = vpop.permute.xlu0 %764  ;;  %v657_v54 = vsel %vm284_vm2, %v646_v50, 0  ;;  %v1694_v40 = vld [vmem:[%s2384_s0 + $0x20] sm:$0xf]  ;;  %v1400_v43 = vsub.s32 2, %v2085_v3 }
  0xa7   : > { %1746 = vmatpush3.bf16.msra.mxu1 %v528_v44  ;;  %1747 = vmatprep.mubr.msk.bf16.mxu1 %vm1983_vm0, %v1981_v5 }
  0xa8   : > { %1751 = vmatprep.subr.bf16.mxu1 %v1981_v5  ;;  %v767_v48 = vpop.permute.xlu1 %766 }
  0xa9   : > { %v773_v57 = vsel %vm772_vm6, %v765_v45, %v767_v48 }
  0xaa   : > { %v769_v49 = vpop.permute.xlu0 %768  ;;  %v780_v62 = vsel %vm284_vm2, %v773_v57, 0 }
  0xab   : > { %v774_v53 = vsel %vm772_vm6, %v767_v48, %v769_v49 }
  0xac   : > { %v771_v56 = vpop.permute.xlu1 %770 }
  0xad   : > { %v775_v60 = vsel %vm772_vm6, %v769_v49, %v771_v56 }
  0xae   : > { %v894_v55 = vpop.permute.xlu0 %893  ;;  %v786_v0 = vsel %vm284_vm2, %v775_v60, 0 }
  0xb0   : > { %1672 = vmatmul.mubr.msk.bf16.vlgmr.msra.gmra.mrb[0].mxu0 %vm280_vm3, %v1670_v51  ;;  %v896_v58 = vpop.permute.xlu1 %895 }
  0xb1   : > { %660 = vmatpush1.bf16.msra.mxu0 %v651_v52  ;;  %691 = vmatprep.mubr.bf16.mxu0 %v1982_v6  ;;  %v902_v4 = vsel %vm901_vm7, %v894_v55, %v896_v58 }
  0xb2   : > { %1748 = vmatmul.mubr.msk.bf16.vlgmr.msra.gmra.mrb[0].mxu1 %vm280_vm3, %v1670_v51  ;;  %1679 = vmatprep.subr.msk.bf16.mxu0 %vm284_vm2, %v774_v53  ;;  %v898_v59 = vpop.permute.xlu0 %897  ;;  %v909_v11 = vsel %vm284_vm2, %v902_v4, 0 }
  0xb3   : > { %1752 = vmatpush3.bf16.msra.mxu1 %v657_v54  ;;  %1753 = vmatprep.mubr.msk.bf16.mxu1 %vm1983_vm0, %v1981_v5  ;;  %v903_v63 = vsel %vm901_vm7, %v896_v58, %v898_v59 }
  0xb4   : > { %1757 = vmatprep.subr.bf16.mxu1 %v1981_v5  ;;  %v900_v2 = vpop.permute.xlu1 %899 }
  0xb5   : > { %v904_v9 = vsel %vm901_vm7, %v898_v59, %v900_v2 }
  0xb6   : > { %v1023_v1 = vpop.permute.xlu0 %1022  ;;  %v915_v13 = vsel %vm284_vm2, %v904_v9, 0 }
  0xb8   : > { %v1025_v7 = vpop.permute.xlu1 %1024 }
  0xb9   : > { %v1031_v16 = vsel %vm1030_vm8, %v1023_v1, %v1025_v7 }
  0xba   : > { %v1027_v8 = vpop.permute.xlu0 %1026  ;;  %v1038_v21 = vsel %vm284_vm2, %v1031_v16, 0 }
  0xbb   : > { %v1032_v12 = vsel %vm1030_vm8, %v1025_v7, %v1027_v8 }
  0xbc   : > { %1676 = vmatmul.mubr.msk.bf16.vlgmr.msra.gmra.mrb[0].mxu0 %vm280_vm3, %v1674_v61  ;;  %v1029_v15 = vpop.permute.xlu1 %1028 }
  0xbd   : > { %789 = vmatpush1.bf16.msra.mxu0 %v780_v62  ;;  %820 = vmatprep.mubr.bf16.mxu0 %v1982_v6  ;;  %v1033_v19 = vsel %vm1030_vm8, %v1027_v8, %v1029_v15 }
  0xbe   : > { %1754 = vmatmul.mubr.msk.bf16.vlgmr.msra.gmra.mrb[0].mxu1 %vm280_vm3, %v1674_v61  ;;  %1683 = vmatprep.subr.msk.bf16.mxu0 %vm284_vm2, %v903_v63  ;;  %v1152_v14 = vpop.permute.xlu0 %1151  ;;  %v1044_v23 = vsel %vm284_vm2, %v1033_v19, 0 }
  0xbf   : > { %1758 = vmatpush3.bf16.msra.mxu1 %v786_v0  ;;  %1759 = vmatprep.mubr.msk.bf16.mxu1 %vm1983_vm0, %v1981_v5 }
  0xc0   : > { %1763 = vmatprep.subr.bf16.mxu1 %v1981_v5  ;;  %v1154_v17 = vpop.permute.xlu1 %1153 }
  0xc1   : > { %v1160_v26 = vsel %vm1159_vm9, %v1152_v14, %v1154_v17 }
  0xc2   : > { %v1156_v18 = vpop.permute.xlu0 %1155  ;;  %v1167_v31 = vsel %vm284_vm2, %v1160_v26, 0 }
  0xc3   : > { %v1161_v22 = vsel %vm1159_vm9, %v1154_v17, %v1156_v18 }
  0xc4   : > { %v1158_v25 = vpop.permute.xlu1 %1157 }
  0xc5   : > { %v1162_v29 = vsel %vm1159_vm9, %v1156_v18, %v1158_v25 }
  0xc6   : > { %v1281_v24 = vpop.permute.xlu0 %1280  ;;  %v1173_v33 = vsel %vm284_vm2, %v1162_v29, 0 }
  0xc8   : > { %1680 = vmatmul.mubr.msk.bf16.vlgmr.msra.gmra.mrb[0].mxu0 %vm280_vm3, %v1678_v10  ;;  %v1283_v27 = vpop.permute.xlu1 %1282 }
  0xc9   : > { %918 = vmatpush1.bf16.msra.mxu0 %v909_v11  ;;  %949 = vmatprep.mubr.bf16.mxu0 %v1982_v6  ;;  %v1289_v35 = vsel %vm1288_vm10, %v1281_v24, %v1283_v27 }
  0xca   : > { %1760 = vmatmul.mubr.msk.bf16.vlgmr.msra.gmra.mrb[0].mxu1 %vm280_vm3, %v1678_v10  ;;  %1687 = vmatprep.subr.msk.bf16.mxu0 %vm284_vm2, %v1032_v12  ;;  %v1285_v28 = vpop.permute.xlu0 %1284  ;;  %v1296_v38 = vsel %vm284_vm2, %v1289_v35, 0 }
  0xcb   : > { %1764 = vmatpush3.bf16.msra.mxu1 %v915_v13  ;;  %1765 = vmatprep.mubr.msk.bf16.mxu1 %vm1983_vm0, %v1981_v5  ;;  %v1290_v32 = vsel %vm1288_vm10, %v1283_v27, %v1285_v28 }
  0xcc   : > { %1769 = vmatprep.subr.bf16.mxu1 %v1981_v5  ;;  %v1287_v34 = vpop.permute.xlu1 %1286 }
  0xcd   : > { %v1291_v36 = vsel %vm1288_vm10, %v1285_v28, %v1287_v34 }
  0xce   : > { %v1302_v39 = vsel %vm284_vm2, %v1291_v36, 0 }
  0xd4   : > { %1684 = vmatmul.mubr.msk.bf16.vlgmr.msra.gmra.mrb[0].mxu0 %vm280_vm3, %v1682_v20 }
  0xd5   : > { %1047 = vmatpush1.bf16.msra.mxu0 %v1038_v21  ;;  %1078 = vmatprep.mubr.bf16.mxu0 %v1982_v6 }
  0xd6   : > { %1766 = vmatmul.mubr.msk.bf16.vlgmr.msra.gmra.mrb[0].mxu1 %vm280_vm3, %v1682_v20  ;;  %1691 = vmatprep.subr.msk.bf16.mxu0 %vm284_vm2, %v1161_v22 }
  0xd7   : > { %1770 = vmatpush3.bf16.msra.mxu1 %v1044_v23  ;;  %1771 = vmatprep.mubr.msk.bf16.mxu1 %vm1983_vm0, %v1981_v5 }
  0xd8   : > { %1775 = vmatprep.subr.bf16.mxu1 %v1981_v5 }
  0xe0   : > { %1688 = vmatmul.mubr.msk.bf16.vlgmr.msra.gmra.mrb[0].mxu0 %vm280_vm3, %v1686_v30 }
  0xe1   : > { %1176 = vmatpush1.bf16.msra.mxu0 %v1167_v31  ;;  %1207 = vmatprep.mubr.bf16.mxu0 %v1982_v6 }
  0xe2   : > { %1772 = vmatmul.mubr.msk.bf16.vlgmr.msra.gmra.mrb[0].mxu1 %vm280_vm3, %v1686_v30  ;;  %1695 = vmatprep.subr.msk.bf16.mxu0 %vm284_vm2, %v1290_v32  ;;  %vm1509_vm2 = vcmask 818176  }
  0xe3   : > { %1776 = vmatpush3.bf16.msra.mxu1 %v1173_v33  ;;  %1777 = vmatprep.mubr.msk.bf16.mxu1 %vm1983_vm0, %v1981_v5 }
  0xe4   : > { %1781 = vmatprep.subr.bf16.mxu1 %v1981_v5 }
  0xec   : > { %1692 = vmatmul.mubr.msk.bf16.vlgmr.msra.gmra.mrb[0].mxu0 %vm280_vm3, %v1690_v37 }
  0xed   : > { %1305 = vmatpush1.bf16.msra.mxu0 %v1296_v38  ;;  %1336 = vmatprep.mubr.bf16.mxu0 %v1982_v6  ;;  %v1388_v6 = vld [vmem:[%s2386_s2] sm:$0x7] }
  0xee   : > { %1778 = vmatmul.mubr.msk.bf16.vlgmr.msra.gmra.mrb[0].mxu1 %vm280_vm3, %v1690_v37  ;;  %v2251_v44 = vrot.slane %v1388_v6, %v1396_v42  ;;  %v2253_v45 = vrot.slane %v1388_v6, %v1400_v43 }
  0xef   : > { %1782 = vmatpush3.bf16.msra.mxu1 %v1302_v39  ;;  %1783 = vmatprep.mubr.msk.bf16.mxu1 %vm1983_vm0, %v1981_v5  ;;  %v2247_v5 = vrot.slane %v1388_v6, %v1392_v41  ;;  %vm1453_vm0 = vcmask 650752  }
  0xf8   : > { %1696 = vmatmul.mubr.msk.bf16.vlgmr.msra.gmra.mrb[0].mxu0 %vm280_vm3, %v1694_v40 }
  0xfa   : > { %1784 = vmatmul.mubr.msk.bf16.vlgmr.msra.gmra.mrb[0].mxu1 %vm280_vm3, %v1694_v40  ;;  %vm1463_vm3 = vcmask 913152  }
 0x1cb   : > { %v2255_v46 = vpop.f32.mrb[0].mxu0 }
 0x1cc   : > { %v2259_v47 = vpack.c.bf16 %v2255_v46, %v2255_v46  ;;  %v2261_v48 = vpop.f32.mrb[1].mxu0  ;;  %v1405_v3 = vmul.f32 %v2247_v5, %v2255_v46 }
 0x1cd   : > { %v1342_v49 = vpop.f32.mrb[2].mxu0  ;;  %v2265_v50 = vpop.f32.mrb[0].mxu1  ;;  %v1406_v51 = vmul.f32 %v2251_v44, %v2261_v48  ;;  %v1710_v52 = vpack.c.bf16 %v2261_v48, %v2255_v46  ;;  %v1711_v61 = vpack.c.bf16 %v2261_v48, %v2261_v48 }
 0x1ce   : > { %1435 = vrot.lane.b32.xlu1 %v2259_v47, %s1985_s11  ;;  %v1343_v53 = vpop.f32.mrb[3].mxu0  ;;  %v1785_v54 = vpop.f32.mrb[1].mxu1  ;;  %v1407_v55 = vmul.f32 %v2253_v45, %v2265_v50  ;;  %v1712_v56 = vpack.c.bf16 %v2265_v50, %v2261_v48  ;;  %1431 = vst.msk [vmem:[%s2277_s16] sm:$0xf] %vm1430_vm11, %v2259_v47  ;;  %s1993_s11 = smov 122   ;;  %v1713_v62 = vpack.c.bf16 %v2265_v50, %v2265_v50 }
 0x1cf   : > { %v1382_v57 = vpop.f32.mrb[2].mxu1  ;;  %v1408_v58 = vadd.f32 %v1406_v51, %v1405_v3 }
 0x1d0   : > { %v1786_v59 = vpop.f32.mrb[3].mxu1 }
 0x1d1   : > { %v1409_v60 = vadd.f32 %v1408_v58, %v1407_v55 }
 0x1d2   : > { %1440 = vrot.lane.b32.xlu1 %v2259_v47, %s1992_s17  ;;  %s239_s17 = scalar_lea.vmem %s2388_s4, %s2089_s6 }
 0x1d3   : > { %1410 = vadd.xlane.f32.xlu0 %v1409_v60 }
 0x1d6   : > { %1445 = vrot.lane.b32.xlu1 %v2259_v47, %s1993_s11  ;;  %s2003_s11 = smov 116  }
 0x1da   : > { %1506 = vrot.lane.b32.xlu1 %v1712_v56, %s1994_s23 }
 0x1de   : > { %1469 = vrot.lane.b32.xlu1 %v1710_v52, %s1995_s25 }
 0x1e2   : > { %1455 = vrot.lane.b32.xlu1 %v2259_v47, %s1996_s26  ;;  %s243_s26 = scalar_lea.vmem %s2389_s5, %s2089_s6 }
 0x1e9   : > { %1478 = vrot.lane.b32.xlu0 %v1711_v61, %s1997_s30  ;;  %s1714_s30 = sshll.u32 %s2056_s22, 7  ;;  %s1519_s22 = scalar_lea.sflag [#allocation3], %s216_s13 }
 0x1ed   : > { %1482 = vrot.lane.b32.xlu0 %v1711_v61, %s1986_s12 }
 0x1f1   : > { %1486 = vrot.lane.b32.xlu0 %v1711_v61, %s1988_s14 }
 0x1f5   : > { %1490 = vrot.lane.b32.xlu0 %v1711_v61, %s1998_s7  ;;  %s1541_s7 = sshll.u32 %s2277_s16, 4  ;;  %s2338_s7 = int_to_ptr.vmem [resolvable:$true] %s1541_s7 }
 0x1f6   : > { %s1916_s6 = scalar_lea.vmem %s2338_s7, 128 }
 0x1f7   : > { %p1917_p11 = scmp.ne.s32.totalorder %s2338_s7, %s1916_s6 }
 0x1f9   : > { %1450 = vrot.lane.b32.xlu0 %v2259_v47, %s1999_s8  ;;  %p1918_p12 = pnand %p1917_p11, %p2073_p5 }
 0x1fb   : > { %p1919_p13 = pneg %p1918_p12 }
 0x1fd   : > { %1494 = vrot.lane.b32.xlu0 %v1711_v61, %s2000_s9 }
 0x201   : > { %1498 = vrot.lane.b32.xlu0 %v1711_v61, %s2001_s10  ;;  %s2336_s10 = scalar_lea.hbm %s2387_s3, %s1714_s30 }
 0x205   : > { %1514 = vrot.lane.b32.xlu0 %v1713_v62, %s2002_s15  ;;  %s2004_s15 = smov [#allocation2]  }
 0x206   : > { %s1920_s12 = sshll.u32 %s2004_s15, 4  ;;  %s1921_s12 = int_to_ptr.vmem [resolvable:$false] %s1920_s12 }
 0x207   : > { %s1922_s14 = scalar_lea.vmem %s1921_s12, 256  ;;  %p1923_p0 = scmp.lt.s32.totalorder %s2338_s7, %s1921_s12 }
 0x208   : > { %p1924_p1 = scmp.lt.s32.totalorder %s1922_s14, %s1916_s6 }
 0x20a   : > { %p1925_p2 = por %p1924_p1, %p1923_p0 }
 0x20c   : > { %p1926_p3 = pnand %p1925_p2, %p1919_p13 }
 0x240   : > { %v1436_v63 = vpop.permute.xlu1 %1435 }
 0x241   : > { %1439 = vst.msk [vmem:[%s2277_s16] sm:$0xf] %vm1438_vm12, %v1436_v63 }
 0x244   : > { %v1441_v0 = vpop.permute.xlu1 %1440 }
 0x245   : > { %1444 = vst.msk [vmem:[%s2277_s16] sm:$0xf] %vm1443_vm13, %v1441_v0 }
 0x248   : > { %v1446_v1 = vpop.permute.xlu1 %1445 }
 0x249   : > { %1449 = vst.msk [vmem:[%s2277_s16] sm:$0xf] %vm1448_vm14, %v1446_v1 }
 0x24c   : > { %v1507_v17 = vpop.permute.xlu1 %1506 }
 0x24d   : > { %v1508_v27 = vrot.slane %v1507_v17, 4 }
 0x24f   : > { %v1510_v29 = vsel %vm1509_vm2, %v1507_v17, %v1508_v27 }
 0x250   : > { %v1470_v22 = vpop.permute.xlu1 %1469 }
 0x251   : > { %v1471_v32 = vrot.slane %v1470_v22, 4 }
 0x253   : > { %v1473_v34 = vsel %vm1472_vm5, %v1470_v22, %v1471_v32 }
 0x254   : > { %v1456_v25 = vpop.permute.xlu1 %1455 }
 0x260   : > { %v1411_v2 = vpop.xlane.xlu0 %1410 }
 0x261   : > { %v1412_v4 = vmul.f32 0.00390625, %v1411_v2  ;;  %1420 = vst.msk [vmem:[%s239_s17] sm:$0xff] %vm1419_vm15, %v1411_v2 }
 0x263   : > { %v1413_v7 = vsub.f32 %v2255_v46, %v1412_v4  ;;  %v1414_v8 = vsub.f32 %v2261_v48, %v1412_v4  ;;  %v1415_v9 = vsub.f32 %v2265_v50, %v1412_v4 }
 0x264   : > { %v1479_v10 = vpop.permute.xlu0 %1478 }
 0x265   : > { %1481 = vst.msk [vmem:[%s2277_s16 + $0x4] sm:$0xf] %vm1430_vm11, %v1479_v10  ;;  %v1416_v11 = vmul.f32 %v1413_v7, %v2247_v5  ;;  %v1417_v12 = vmul.f32 %v1414_v8, %v2251_v44  ;;  %v1418_v13 = vmul.f32 %v1415_v9, %v2253_v45 }
 0x267   : > { %v1421_v14 = vmul.f32 %v1416_v11, %v1416_v11  ;;  %v1422_v15 = vmul.f32 %v1417_v12, %v1417_v12  ;;  %v1423_v18 = vmul.f32 %v1418_v13, %v1418_v13 }
 0x268   : > { %v1483_v16 = vpop.permute.xlu0 %1482 }
 0x269   : > { %1485 = vst.msk [vmem:[%s2277_s16 + $0x4] sm:$0xf] %vm1438_vm12, %v1483_v16  ;;  %v1424_v19 = vadd.f32 %v1422_v15, %v1421_v14 }
 0x26b   : > { %v1425_v20 = vadd.f32 %v1424_v19, %v1423_v18 }
 0x26c   : > { %v1487_v21 = vpop.permute.xlu0 %1486 }
 0x26d   : > { %1489 = vst.msk [vmem:[%s2277_s16 + $0x4] sm:$0xf] %vm1443_vm13, %v1487_v21  ;;  %1426 = vadd.xlane.f32.xlu1 %v1425_v20 }
 0x270   : > { %v1491_v23 = vpop.permute.xlu0 %1490 }
 0x271   : > { %1493 = vst.msk [vmem:[%s2277_s16 + $0x4] sm:$0xf] %vm1448_vm14, %v1491_v23 }
 0x274   : > { %v1451_v24 = vpop.permute.xlu0 %1450 }
 0x275   : > { %1454 = vst.msk [vmem:[%s2277_s16] sm:$0xf] %vm1453_vm0, %v1451_v24 }
 0x276   : > { %1459 = vst.msk [vmem:[%s2277_s16] sm:$0xf] %vm1458_vm1, %v1456_v25 }
 0x278   : > { %v1495_v26 = vpop.permute.xlu0 %1494 }
 0x279   : > { %1497 = vst.msk [vmem:[%s2277_s16 + $0x4] sm:$0xf] %vm1453_vm0, %v1495_v26 }
 0x27c   : > { %v1499_v28 = vpop.permute.xlu0 %1498 }
 0x27d   : > { %1501 = vst.msk [vmem:[%s2277_s16 + $0x4] sm:$0xf] %vm1458_vm1, %v1499_v28 }
 0x27e   : > { %1460 = vrot.lane.b32.xlu1 %v2259_v47, %s2003_s11  ;;  %1512 = vst.msk [vmem:[%s2277_s16 + $0x4] sm:$0xf] %vm1463_vm3, %v1510_v29 }
 0x280   : > { %v1515_v30 = vpop.permute.xlu0 %1514 }
 0x281   : > { %1517 = vst.msk [vmem:[%s2277_s16 + $0x4] sm:$0xf] %vm1475_vm4, %v1515_v30 }
 0x2fa   : > { %v1427_v31 = vpop.xlane.xlu1 %1426 }
 0x2fb   : > { %1428 = vst.msk [vmem:[%s243_s26] sm:$0xff] %vm1419_vm15, %v1427_v31 }
 0x2fe   : > { %v1461_v33 = vpop.permute.xlu1 %1460 }
 0x2ff   : > { %1464 = vst.msk [vmem:[%s2277_s16] sm:$0xf] %vm1463_vm3, %v1461_v33 }
 0x300   : > { %1476 = vst.msk [vmem:[%s2277_s16] sm:$0xf] %vm1475_vm4, %v1473_v34 }
 0x301   : > { %1929 = shalt.err (!%p1926_p3)
}
 0x302   : > { %s1930_s13 = scalar_lea.hbm %s2336_s10, 128  ;;  %s1934_s11 = scalar_lea.hbm %s2387_s3, 256 }
 0x303   : > { %p1931_p4 = scmp.ne.s32.totalorder %s2336_s10, %s1930_s13  ;;  %p1935_p9 = scmp.lt.u32.totalorder %s2336_s10, %s2387_s3 }
 0x304   : > { %p1936_p10 = scmp.lt.u32.totalorder %s1934_s11, %s1930_s13  ;;  %p1938_p12 = scmp.lt.u32.totalorder %s1930_s13, %s2336_s10 }
 0x305   : > { %p1932_p7 = pnand %p1931_p4, %p2073_p5 }
 0x306   : > { %p1937_p11 = por %p1936_p10, %p1935_p9 }
 0x307   : > { %p1933_p8 = pneg %p1932_p7 }
 0x308   : > { %p1939_p13 = por %p1938_p12, %p1937_p11 }
 0x30a   : > { %p1940_p0 = pnand %p1939_p13, %p1933_p8 }
 0x30c   : > { %1943 = shalt.err (!%p1940_p0)
}
 0x30d   : > { %1851 = dma.vmem_to_hbm [thread:$0]  (%p2073_p5), %s2338_s7, 128, %s2336_s10, %s1519_s22  }
 0x30e PF: > { %p1857_p1 = scmp.ge.s32.totalorder %s1978_s21, 2  ;;  %s1559_s26 = sand.u32 1, %s1966_s18  }
 0x30f   : > { %s1560_s30 = scalar_lea.sflag [#allocation3], %s1559_s26 }
 0x310   : > { %p1854_p2 = pnand %p1857_p1, %p2077_p6 }
 0x312   : > { %1961 = dma.done.wait (!%p1854_p2), %s1560_s30, 128  }
 0x313   : > { %1963 = vsyncadd (!%p1854_p2), %s1560_s30, 4294967168  ;;  %p16_p3 = scmp.ge.s32.totalorder %s2060_s24, 4   ;;  %s2392_s18 = smov %s1970_s19 }
 0x314   : > { %s2393_s19 = smov %s1974_s20  ;;  %s2394_s20 = smov %s2071_s27 }
 0x315   : > { %s2395_s21 = smov %s2060_s24  ;;  %18 = sbr.rel (!%p16_p3) target bundleno = 3 (0x3), region = 99 }
 0x31c   :  { %1579 = vsyncpa [#allocation3], 1 }
 0x31d   :  { %1581 = vsyncpa [#allocation3 + $0x1], 1 }

</bundles_post_ra>
